<compile_context>
chip_gen: v7x
topology: tpu7x:2x2x1
jax: 0.10.0
libtpu: 0.0.40
codegen_flags: <defaults>
</compile_context>

<pallas_src>
import functools

import jax
import jax.numpy as jnp
from jax.experimental import pallas as pl
from jax.experimental.pallas import tpu as pltpu

EPS = 1e-5
NEG_SLOPE = 0.2
LANE = 128
SUBLANE = 8

# Rows of the packed per-feature vector slab.
_ROW_G1, _ROW_B1, _ROW_G2, _ROW_B2BS = 0, 1, 2, 3


def _leaky_relu(x):
    # mul + max (2 VALU ops) instead of mul + cmp + select (3).
    return jnp.maximum(x, NEG_SLOPE * x)


def _bn_train(h, gamma, beta):
    # Training-mode BN over the batch axis, two-pass centered variance (numerically safe),
    # affine folded so the remaining [B,F] work is one scale-and-shift pass.
    # rsqrt goes to the EUP slot (free-ish alongside VALU work).
    mean = jnp.mean(h, axis=0, keepdims=True)       # [1,F]
    d = h - mean                                    # [B,F]
    var = jnp.mean(d * d, axis=0, keepdims=True)    # [1,F]
    scale = jax.lax.rsqrt(var + EPS) * gamma        # [1,F]
    return d * scale + beta


def residual_block_kernel(x_ref, w1s_ref, w2_ref, vec_ref, o_ref, *, out_pad, matmul_dtype):
    x = x_ref[...]
    vec = vec_ref[...]                               # [8, out_pad] packed slab, one DMA
    g1 = vec[_ROW_G1:_ROW_G1 + 1]
    be1 = vec[_ROW_B1:_ROW_B1 + 1]
    g2 = vec[_ROW_G2:_ROW_G2 + 1]
    b2bs = vec[_ROW_B2BS:_ROW_B2BS + 1]              # beta2 + bs, pre-folded in prepare

    xm = x.astype(matmul_dtype)

    # One wide MXU dot for main-matmul-1 AND the shortcut: x staged once into the MXU,
    # result path drained once.  Split at a 128-aligned lane boundary (free slice).
    # NOTE: Linear biases b1/b2 are intentionally omitted -- they are cancelled exactly by
    # the training-mode BN mean subtraction.
    hs = jnp.dot(xm, w1s_ref[...], preferred_element_type=jnp.float32)  # [B, 2*out_pad]
    h = hs[:, :out_pad]
    s = hs[:, out_pad:]

    h = _bn_train(h, g1, be1)
    h = _leaky_relu(h)
    # Dropout -> identity (see TODO at top).
    h2 = jnp.dot(h.astype(matmul_dtype), w2_ref[...], preferred_element_type=jnp.float32)

    # BN2 with the shortcut bias folded into its shift, then add shortcut and activate.
    mean2 = jnp.mean(h2, axis=0, keepdims=True)
    d2 = h2 - mean2
    var2 = jnp.mean(d2 * d2, axis=0, keepdims=True)
    scale2 = jax.lax.rsqrt(var2 + EPS) * g2
    o_ref[...] = _leaky_relu(d2 * scale2 + (b2bs + s))


def _round_up(n, m):
    return ((n + m - 1) // m) * m


def prepare_params(params, matmul_dtype=jnp.float32):
    """One-time prep (outside the per-call hot path): transpose torch [out,in] weights to
    [in,out], pad the OUTPUT feature dim to a multiple of 128 (lane-dense stores), pad the
    contraction dim only to a sublane multiple of 8, concatenate w1||ws into one wide
    operand, optionally cast matmul operands to bf16 (valid on v5e/v6e/v7x), and pack all
    per-feature vectors (with beta2+bs pre-folded) into a single [8, out_pad] slab."""
    out_dim, in_dim = params["w1"].shape
    in_pad = _round_up(in_dim, SUBLANE)     # K dim: sublane multiple only, NOT 128
    out_pad = _round_up(out_dim, LANE)      # output/lane dim: 128 multiple for unmasked vst

    def pad_w(w_t, rows, cols):  # w_t already [in-like, out-like]
        return jnp.pad(w_t, ((0, rows - w_t.shape[0]), (0, cols - w_t.shape[1])))

    w1 = pad_w(params["w1"].T, in_pad, out_pad)
    ws = pad_w(params["ws"].T, in_pad, out_pad)
    w1s = jnp.concatenate([w1, ws], axis=1).astype(matmul_dtype)    # [in_pad, 2*out_pad]
    w2 = pad_w(params["w2"].T, out_pad, out_pad).astype(matmul_dtype)

    def pad_v(v):
        return jnp.pad(v.astype(jnp.float32), (0, out_pad - v.shape[0]))

    zero = jnp.zeros((out_pad,), jnp.float32)
    vec = jnp.stack([
        pad_v(params["bn1_gamma"]),
        pad_v(params["bn1_beta"]),
        pad_v(params["bn2_gamma"]),
        pad_v(params["bn2_beta"] + params["bs"]),    # shortcut bias folded into BN2 shift
        zero, zero, zero, zero,                      # pad slab to 8 sublanes
    ])                                               # [8, out_pad]

    return {
        "w1s": w1s, "w2": w2, "vec": vec,
        "in_dim": in_dim, "out_dim": out_dim,
        "in_pad": in_pad, "out_pad": out_pad,
        "matmul_dtype": matmul_dtype,
    }


def _nbytes(a):
    return int(a.size) * a.dtype.itemsize


def residual_block(x, prep):
    B, in_dim = x.shape
    assert in_dim == prep["in_dim"], "x feature dim mismatch"
    assert B >= 2, "training-mode BatchNorm1d requires batch size >= 2"
    in_pad, out_pad, out_dim = prep["in_pad"], prep["out_pad"], prep["out_dim"]

    # K-dim pad only up to a sublane multiple, and only when actually needed
    # (in_dim % 8 == 0 -> no per-call pad/copy kernel at all).
    x_p = x if in_pad == in_dim else jnp.pad(x, ((0, 0), (0, in_pad - in_dim)))

    # Explicit VMEM budget sized from the actual arrays (everything-resident design),
    # capped well under v7x's 64 MiB physical VMEM.
    need = (_nbytes(x_p) + _nbytes(prep["w1s"]) + _nbytes(prep["w2"])
            + _nbytes(prep["vec"]) + B * out_pad * 4)
    assert need <= 40 * 1024 * 1024, (
        "problem too large for the grid=() resident-in-VMEM path; "
        "implement the tiled-grid TODO at the top of this file")
    vmem_limit = int(min(48 * 1024 * 1024, max(16 * 1024 * 1024, 4 * need)))

    vmem = pl.BlockSpec(memory_space=pltpu.MemorySpace.VMEM)
    kernel = functools.partial(residual_block_kernel,
                               out_pad=out_pad, matmul_dtype=prep["matmul_dtype"])
    out = pl.pallas_call(
        kernel,
        out_shape=jax.ShapeDtypeStruct((B, out_pad), jnp.float32),
        in_specs=[vmem] * 4,
        out_specs=vmem,
        compiler_params=pltpu.CompilerParams(vmem_limit_bytes=vmem_limit),
    )(x_p, prep["w1s"], prep["w2"], prep["vec"])
    # Padded feature columns are exactly zero by construction (gamma/beta/bias padded with
    # zeros); slice them away.
    return out[:, :out_dim]


def reference(x, params):
    # Pure-JAX reference with the PyTorch module's forward semantics
    # (including b1/b2 and the un-folded shortcut bias, proving the kernel's folds exact).
    def bn(h, g, b):
        m = jnp.mean(h, axis=0, keepdims=True)
        v = jnp.mean((h - m) ** 2, axis=0, keepdims=True)
        return (h - m) / jnp.sqrt(v + EPS) * g + b

    def lrelu(v):
        return jnp.where(v >= 0, v, NEG_SLOPE * v)

    h = x @ params["w1"].T + params["b1"]
    h = bn(h, params["bn1_gamma"], params["bn1_beta"])
    h = lrelu(h)
    h = h @ params["w2"].T + params["b2"]
    h = bn(h, params["bn2_gamma"], params["bn2_beta"])
    s = x @ params["ws"].T + params["bs"]
    return lrelu(h + s)


def init_params(key, in_dim, out_dim):
    ks = jax.random.split(key, 6)
    scale1 = 1.0 / jnp.sqrt(in_dim)
    scale2 = 1.0 / jnp.sqrt(out_dim)
    return {
        "w1": jax.random.uniform(ks[0], (out_dim, in_dim), jnp.float32, -scale1, scale1),
        "b1": jax.random.uniform(ks[1], (out_dim,), jnp.float32, -scale1, scale1),
        "bn1_gamma": jnp.ones((out_dim,), jnp.float32),
        "bn1_beta": jnp.zeros((out_dim,), jnp.float32),
        "w2": jax.random.uniform(ks[2], (out_dim, out_dim), jnp.float32, -scale2, scale2),
        "b2": jax.random.uniform(ks[3], (out_dim,), jnp.float32, -scale2, scale2),
        "bn2_gamma": jnp.ones((out_dim,), jnp.float32),
        "bn2_beta": jnp.zeros((out_dim,), jnp.float32),
        "ws": jax.random.uniform(ks[4], (out_dim, in_dim), jnp.float32, -scale1, scale1),
        "bs": jax.random.uniform(ks[5], (out_dim,), jnp.float32, -scale1, scale1),
    }


if __name__ == "__main__":
    B, IN_DIM, OUT_DIM = 8, 32, 64
    key = jax.random.PRNGKey(0)
    kx, kp = jax.random.split(key)
    x = jax.random.normal(kx, (B, IN_DIM), jnp.float32)
    params = init_params(kp, IN_DIM, OUT_DIM)

    ref = reference(x, params)

    # f32 matmul operands: tight parity with the reference.
    prep_f32 = prepare_params(params, matmul_dtype=jnp.float32)
    run_f32 = jax.jit(lambda xx: residual_block(xx, prep_f32))
    out_f32 = jax.block_until_ready(run_f32(x))
    assert out_f32.shape == (B, OUT_DIM)
    err32 = float(jnp.max(jnp.abs(out_f32 - ref)))
    assert jnp.allclose(out_f32, ref, atol=1e-4, rtol=1e-4), err32

    # bf16 matmul operands (recommended on v5e/v6e/v7x at real sizes), f32 accumulation
    # and f32 BN/activation math: loose check.
    prep_bf16 = prepare_params(params, matmul_dtype=jnp.bfloat16)
    run_bf16 = jax.jit(lambda xx: residual_block(xx, prep_bf16))
    out_bf16 = jax.block_until_ready(run_bf16(x))
    err16 = float(jnp.max(jnp.abs(out_bf16 - ref)))
    assert jnp.allclose(out_bf16, ref, atol=1e-1, rtol=1e-1), err16

    print("KERNEL_OK")
</pallas_src>

<mosaic_0001>
module attributes {stable_mosaic.version = 11 : i64} {
  func.func @residual_block_kernel(%arg0: memref<8x32xf32, #tpu.memory_space<vmem>>, %arg1: memref<32x256xf32, #tpu.memory_space<vmem>>, %arg2: memref<128x128xf32, #tpu.memory_space<vmem>>, %arg3: memref<8x128xf32, #tpu.memory_space<vmem>>, %arg4: memref<8x128xf32, #tpu.memory_space<vmem>>) attributes {dimension_semantics = [], scalar_prefetch = 0 : i64, scratch_operands = 0 : i64, tpu.core_type = #tpu.core_type<tc>} {
    %c0 = arith.constant 0 : index
    %c0_0 = arith.constant 0 : index
    %0 = vector.load %arg0[%c0, %c0_0] : memref<8x32xf32, #tpu.memory_space<vmem>>, vector<8x32xf32>
    %c0_1 = arith.constant 0 : index
    %c0_2 = arith.constant 0 : index
    %1 = vector.load %arg3[%c0_1, %c0_2] : memref<8x128xf32, #tpu.memory_space<vmem>>, vector<8x128xf32>
    %2 = vector.extract_strided_slice %1 {offsets = [0, 0], sizes = [1, 128], strides = [1, 1]} : vector<8x128xf32> to vector<1x128xf32>
    %3 = vector.extract_strided_slice %1 {offsets = [1, 0], sizes = [1, 128], strides = [1, 1]} : vector<8x128xf32> to vector<1x128xf32>
    %4 = vector.extract_strided_slice %1 {offsets = [2, 0], sizes = [1, 128], strides = [1, 1]} : vector<8x128xf32> to vector<1x128xf32>
    %5 = vector.extract_strided_slice %1 {offsets = [3, 0], sizes = [1, 128], strides = [1, 1]} : vector<8x128xf32> to vector<1x128xf32>
    %c0_3 = arith.constant 0 : index
    %c0_4 = arith.constant 0 : index
    %6 = vector.load %arg1[%c0_3, %c0_4] : memref<32x256xf32, #tpu.memory_space<vmem>>, vector<32x256xf32>
    %cst = arith.constant dense<0.000000e+00> : vector<8x256xf32>
    %7 = tpu.matmul %0, %6, %cst {dimension_numbers = #tpu.dot_dimension_numbers<[1], [0], [0], [1], [0, 0, 1, 1], [], []>} : vector<8x32xf32>, vector<32x256xf32>, vector<8x256xf32> -> vector<8x256xf32>
    %8 = vector.extract_strided_slice %7 {offsets = [0, 0], sizes = [8, 128], strides = [1, 1]} : vector<8x256xf32> to vector<8x128xf32>
    %9 = vector.extract_strided_slice %7 {offsets = [0, 128], sizes = [8, 128], strides = [1, 1]} : vector<8x256xf32> to vector<8x128xf32>
    %cst_5 = arith.constant dense<0.000000e+00> : vector<128xf32>
    %10 = vector.multi_reduction <add>, %8, %cst_5 [0] : vector<8x128xf32> to vector<128xf32>
    %11 = vector.shape_cast %10 : vector<128xf32> to vector<1x128xf32>
    %cst_6 = arith.constant 8.000000e+00 : f32
    %12 = vector.broadcast %cst_6 : f32 to vector<1x128xf32>
    %13 = arith.divf %11, %12 : vector<1x128xf32>
    %14 = vector.broadcast %13 : vector<1x128xf32> to vector<8x128xf32>
    %15 = arith.subf %8, %14 : vector<8x128xf32>
    %16 = arith.mulf %15, %15 : vector<8x128xf32>
    %cst_7 = arith.constant dense<0.000000e+00> : vector<128xf32>
    %17 = vector.multi_reduction <add>, %16, %cst_7 [0] : vector<8x128xf32> to vector<128xf32>
    %18 = vector.shape_cast %17 : vector<128xf32> to vector<1x128xf32>
    %cst_8 = arith.constant 8.000000e+00 : f32
    %19 = vector.broadcast %cst_8 : f32 to vector<1x128xf32>
    %20 = arith.divf %18, %19 : vector<1x128xf32>
    %cst_9 = arith.constant 9.99999974E-6 : f32
    %21 = vector.broadcast %cst_9 : f32 to vector<1x128xf32>
    %22 = arith.addf %20, %21 : vector<1x128xf32>
    %23 = math.rsqrt %22 : vector<1x128xf32>
    %24 = arith.mulf %23, %2 : vector<1x128xf32>
    %25 = vector.broadcast %24 : vector<1x128xf32> to vector<8x128xf32>
    %26 = arith.mulf %15, %25 : vector<8x128xf32>
    %27 = vector.broadcast %3 : vector<1x128xf32> to vector<8x128xf32>
    %28 = arith.addf %26, %27 : vector<8x128xf32>
    %cst_10 = arith.constant 2.000000e-01 : f32
    %29 = vector.broadcast %cst_10 : f32 to vector<8x128xf32>
    %30 = arith.mulf %29, %28 : vector<8x128xf32>
    %31 = arith.maximumf %28, %30 : vector<8x128xf32>
    %c0_11 = arith.constant 0 : index
    %c0_12 = arith.constant 0 : index
    %32 = vector.load %arg2[%c0_11, %c0_12] : memref<128x128xf32, #tpu.memory_space<vmem>>, vector<128x128xf32>
    %cst_13 = arith.constant dense<0.000000e+00> : vector<8x128xf32>
    %33 = tpu.matmul %31, %32, %cst_13 {dimension_numbers = #tpu.dot_dimension_numbers<[1], [0], [0], [1], [0, 0, 1, 1], [], []>} : vector<8x128xf32>, vector<128x128xf32>, vector<8x128xf32> -> vector<8x128xf32>
    %cst_14 = arith.constant dense<0.000000e+00> : vector<128xf32>
    %34 = vector.multi_reduction <add>, %33, %cst_14 [0] : vector<8x128xf32> to vector<128xf32>
    %35 = vector.shape_cast %34 : vector<128xf32> to vector<1x128xf32>
    %cst_15 = arith.constant 8.000000e+00 : f32
    %36 = vector.broadcast %cst_15 : f32 to vector<1x128xf32>
    %37 = arith.divf %35, %36 : vector<1x128xf32>
    %38 = vector.broadcast %37 : vector<1x128xf32> to vector<8x128xf32>
    %39 = arith.subf %33, %38 : vector<8x128xf32>
    %40 = arith.mulf %39, %39 : vector<8x128xf32>
    %cst_16 = arith.constant dense<0.000000e+00> : vector<128xf32>
    %41 = vector.multi_reduction <add>, %40, %cst_16 [0] : vector<8x128xf32> to vector<128xf32>
    %42 = vector.shape_cast %41 : vector<128xf32> to vector<1x128xf32>
    %cst_17 = arith.constant 8.000000e+00 : f32
    %43 = vector.broadcast %cst_17 : f32 to vector<1x128xf32>
    %44 = arith.divf %42, %43 : vector<1x128xf32>
    %cst_18 = arith.constant 9.99999974E-6 : f32
    %45 = vector.broadcast %cst_18 : f32 to vector<1x128xf32>
    %46 = arith.addf %44, %45 : vector<1x128xf32>
    %47 = math.rsqrt %46 : vector<1x128xf32>
    %48 = arith.mulf %47, %4 : vector<1x128xf32>
    %49 = vector.broadcast %48 : vector<1x128xf32> to vector<8x128xf32>
    %50 = arith.mulf %39, %49 : vector<8x128xf32>
    %51 = vector.broadcast %5 : vector<1x128xf32> to vector<8x128xf32>
    %52 = arith.addf %51, %9 : vector<8x128xf32>
    %53 = arith.addf %50, %52 : vector<8x128xf32>
    %cst_19 = arith.constant 2.000000e-01 : f32
    %54 = vector.broadcast %cst_19 : f32 to vector<8x128xf32>
    %55 = arith.mulf %54, %53 : vector<8x128xf32>
    %56 = arith.maximumf %53, %55 : vector<8x128xf32>
    %c0_20 = arith.constant 0 : index
    %c0_21 = arith.constant 0 : index
    %57 = vector.load %arg4[%c0_20, %c0_21] : memref<8x128xf32, #tpu.memory_space<vmem>>, vector<8x128xf32>
    tpu.vector_store %arg4[%c0_20, %c0_21], %56 {strides = array<i32>} : memref<8x128xf32, #tpu.memory_space<vmem>>, vector<8x128xf32>,
    return
  }
}

</mosaic_0001>

<bundles_post_ra>
// kernel: _lambda_.1
= control target key start
LH: loop header
LB: loop body
LE: loop exit
PB: predicated region body
PF: predicated region fallthrough
CT: control target
= control target key end

     0   :  { %9 = vsyncpa [#allocation3], 0  ;;  %s590_s0 = inlined_call_operand.hbm [shape: f32[8,32], index: 0, kind: input, shape index: {}]   ;;  %s591_s1 = inlined_call_operand.hbm [shape: f32[32,256], index: 1, kind: input, shape index: {}]   ;;  %s592_s2 = inlined_call_operand.hbm [shape: f32[128,128], index: 2, kind: input, shape index: {}]   ;;  %s593_s3 = inlined_call_operand.vmem [shape: f32[8,128], index: 3, kind: input, shape index: {}]   ;;  %s594_s4 = inlined_call_operand.hbm [shape: f32[8,128], index: 4, kind: output, shape index: {}]  }
   0x1   :  { %10 = vsyncpa [#allocation6], 0 }
   0x2   :  { %11 = vsyncpa [#allocation4], 0  ;;  %s503_s15 = smov [#allocation5]   ;;  %s409_s19 = scalar_lea.hbm %s591_s1, 1024 }
   0x3   :  { %s27_s16 = sshll.u32 %s503_s15, 4  ;;  %p410_p0 = scmp.ne.s32.totalorder %s591_s1, %s409_s19  ;;  %s28_s16 = int_to_ptr.vmem [resolvable:$true] %s27_s16 }
   0x4   :  { %p413_p1 = scmp.lt.u32.totalorder %s409_s19, %s591_s1 }
   0x6   :  { %p415_p2 = pnand %p413_p1, %p410_p0 }
   0x8   :  { %418 = shalt.err (!%p415_p2)
}
   0x9   :  { %s419_s24 = scalar_lea.vmem %s28_s16, 1024  ;;  %p424_p4 = scmp.lt.s32.totalorder %s28_s16, %s28_s16 }
   0xa   :  { %p420_p3 = scmp.ne.s32.totalorder %s28_s16, %s419_s24  ;;  %p425_p5 = scmp.lt.s32.totalorder %s419_s24, %s419_s24 }
   0xc   :  { %p426_p6 = por %p425_p5, %p424_p4 }
   0xe   :  { %p427_p7 = pnand %p426_p6, %p420_p3 }
  0x10   :  { %430 = shalt.err (!%p427_p7)
}
  0x11   :  { %s504_s25 = smov 256   ;;  %s505_s26 = smov 16  }
  0x12   :  { %33 = dma.hbm_to_vmem [thread:$0]  %s591_s1, 1024, %s28_s16, [#allocation6], %s504_s25, %s504_s25, %s505_s26  }
  0x13   :  { %s506_s29 = smov [#allocation2]   ;;  %s507_s5 = smov [#allocation7]  }
  0x14   :  { %s18_s30 = sshll.u32 %s506_s29, 4  ;;  %s39_s6 = sshll.u32 %s507_s5, 4  ;;  %s19_s30 = int_to_ptr.vmem [resolvable:$true] %s18_s30  ;;  %s40_s6 = int_to_ptr.vmem [resolvable:$true] %s39_s6 }
  0x15   :  { %s431_s9 = scalar_lea.hbm %s590_s0, 128 }
  0x16   :  { %p432_p8 = scmp.ne.s32.totalorder %s590_s0, %s431_s9  ;;  %p435_p9 = scmp.lt.u32.totalorder %s431_s9, %s590_s0 }
  0x18   :  { %p437_p10 = pnand %p435_p9, %p432_p8 }
  0x1a   :  { %440 = shalt.err (!%p437_p10)
}
  0x1b   :  { %s441_s1 = scalar_lea.vmem %s19_s30, 128  ;;  %p446_p12 = scmp.lt.s32.totalorder %s19_s30, %s19_s30 }
  0x1c   :  { %p442_p11 = scmp.ne.s32.totalorder %s19_s30, %s441_s1  ;;  %p447_p13 = scmp.lt.s32.totalorder %s441_s1, %s441_s1 }
  0x1e   :  { %p448_p0 = por %p447_p13, %p446_p12 }
  0x20   :  { %p449_p1 = pnand %p448_p0, %p442_p11 }
  0x22   :  { %452 = shalt.err (!%p449_p1)
}
  0x23   :  { %21 = dma.hbm_to_vmem [thread:$0]  %s590_s0, 128, %s19_s30, [#allocation3]  }
  0x24   :  { %s453_s18 = scalar_lea.hbm %s592_s2, 2048 }
  0x25   :  { %p454_p2 = scmp.ne.s32.totalorder %s592_s2, %s453_s18  ;;  %p457_p3 = scmp.lt.u32.totalorder %s453_s18, %s592_s2 }
  0x27   :  { %p459_p4 = pnand %p457_p3, %p454_p2 }
  0x29   :  { %462 = shalt.err (!%p459_p4)
}
  0x2a   :  { %s463_s23 = scalar_lea.vmem %s40_s6, 2048  ;;  %p468_p6 = scmp.lt.s32.totalorder %s40_s6, %s40_s6 }
  0x2b   :  { %p464_p5 = scmp.ne.s32.totalorder %s40_s6, %s463_s23  ;;  %p469_p7 = scmp.lt.s32.totalorder %s463_s23, %s463_s23 }
  0x2d   :  { %p470_p8 = por %p469_p7, %p468_p6 }
  0x2f   :  { %p471_p9 = pnand %p470_p8, %p464_p5 }
  0x31   :  { %474 = shalt.err (!%p471_p9)
}
  0x32   :  { %s508_s0 = smov 128   ;;  %s509_s24 = smov 8  }
  0x33   :  { %45 = dma.hbm_to_vmem [thread:$0]  %s592_s2, 2048, %s40_s6, [#allocation6], %s508_s0, %s508_s0, %s509_s24  }
  0x34   :  { %497 = dma.done.wait [#allocation3], 128  }
  0x35   :  { %498 = vsyncadd [#allocation3], 4294967168 }
  0x36   :  { %499 = dma.done.wait [#allocation6], 3072  }
  0x37   :  { %500 = vsyncadd [#allocation6], 4294964224  ;;  %v510_v0 = vmov 0.0   ;;  %v60_v1 = vld [vmem:[#allocation5 + $0x8] sm:$0xff]  ;;  %v62_v2 = vld [vmem:[#allocation5 + $0x18] sm:$0xff]  ;;  %vm67_vm0 = vcmask 261120   ;;  %v162_v58 = vlaneseq }
  0x38   :  { %135 = vmatprep.mubr.f32.mxu0 %v510_v0  ;;  %v59_v3 = vld [vmem:[#allocation5] sm:$0xff]  ;;  %v362_v4 = vpack.c.bf16 %v62_v2, %v60_v1  ;;  %v61_v5 = vld [vmem:[#allocation5 + $0x10] sm:$0xff]  ;;  %v64_v6 = vld [vmem:[#allocation5 + $0x28] sm:$0xff]  ;;  %v511_v17 = vmov 0.0|0.0   ;;  %vm512_vm1 = vmmov 0  }
  0x39   :  { %v66_v7 = vld [vmem:[#allocation5 + $0x38] sm:$0xff]  ;;  %v364_v8 = vpack.c.bf16 %v61_v5, %v59_v3  ;;  %v63_v10 = vld [vmem:[#allocation5 + $0x20] sm:$0xff]  ;;  %v65_v11 = vld [vmem:[#allocation5 + $0x30] sm:$0xff]  ;;  %370 = vmatprep.subr.bf16.mxu1 %v511_v17  ;;  %359 = vmatprep.mubr.msk.f32.mxu1 %vm512_vm1, %v510_v0  ;;  %v163_v59 = vshrl.u32 %v162_v58, 7 }
  0x3a   :  { %v366_v9 = vpack.c.bf16 %v66_v7, %v64_v6  ;;  %363 = vmatprep.subr.bf16.mxu0 %v362_v4  ;;  %v368_v12 = vpack.c.bf16 %v65_v11, %v63_v10  ;;  %v57_v13 = vld [vmem:[#allocation2] sm:$0xff]  ;;  %v174_v14 = vld [vmem:[#allocation7] sm:$0xff]  ;;  %v175_v15 = vld [vmem:[#allocation7 + $0x8] sm:$0xff] }
  0x3b   :  { %365 = vmatpush1.bf16.msra.mxu0 %v364_v8  ;;  %v371_v16 = vpack.c.bf16 %v175_v15, %v174_v14  ;;  %v176_v18 = vld [vmem:[#allocation7 + $0x10] sm:$0xff]  ;;  %v177_v19 = vld [vmem:[#allocation7 + $0x18] sm:$0xff]  ;;  %v178_v21 = vld [vmem:[#allocation7 + $0x20] sm:$0xff]  ;;  %v164_v60 = vsub.s32 0, %v163_v59  ;;  %v169_v61 = vsub.s32 1, %v163_v59 }
  0x3c   :  { %367 = vmatprep.subr.bf16.mxu0 %v366_v9  ;;  %v374_v20 = vpack.c.bf16 %v177_v19, %v176_v18  ;;  %v179_v22 = vld [vmem:[#allocation7 + $0x28] sm:$0xff]  ;;  %v180_v24 = vld [vmem:[#allocation7 + $0x30] sm:$0xff]  ;;  %v181_v25 = vld [vmem:[#allocation7 + $0x38] sm:$0xff] }
  0x3d   :  { %372 = vmatpush3.bf16.msra.mxu1 %v371_v16  ;;  %v377_v23 = vpack.c.bf16 %v179_v22, %v178_v21  ;;  %v380_v26 = vpack.c.bf16 %v181_v25, %v180_v24  ;;  %v182_v27 = vld [vmem:[#allocation7 + $0x40] sm:$0xff]  ;;  %v183_v28 = vld [vmem:[#allocation7 + $0x48] sm:$0xff]  ;;  %v184_v30 = vld [vmem:[#allocation7 + $0x50] sm:$0xff] }
  0x3e   :  { %373 = vmatprep.subr.bf16.mxu1 %v511_v17  ;;  %v383_v29 = vpack.c.bf16 %v183_v28, %v182_v27  ;;  %v185_v31 = vld [vmem:[#allocation7 + $0x58] sm:$0xff]  ;;  %v186_v33 = vld [vmem:[#allocation7 + $0x60] sm:$0xff]  ;;  %v187_v34 = vld [vmem:[#allocation7 + $0x68] sm:$0xff]  ;;  %v281_v27 = vsub.s32 2, %v163_v59 }
  0x3f   :  { %369 = vmatpush1.bf16.msra.mxu0 %v368_v12  ;;  %v386_v32 = vpack.c.bf16 %v185_v31, %v184_v30  ;;  %v389_v35 = vpack.c.bf16 %v187_v34, %v186_v33  ;;  %v188_v36 = vld [vmem:[#allocation7 + $0x70] sm:$0xff]  ;;  %v189_v37 = vld [vmem:[#allocation7 + $0x78] sm:$0xff] }
  0x40   :  { %v392_v38 = vpack.c.bf16 %v189_v37, %v188_v36  ;;  %v58_v63 = vld [vmem:[%s593_s3] sm:$0xff]  ;;  %s513_s3 = smov [#allocation8]  }
  0x41   :  { %375 = vmatpush3.bf16.msra.mxu1 %v374_v20  ;;  %v170_v2 = vrot.slane %v58_v63, %v169_v61  ;;  %s299_s28 = sshll.u32 %s513_s3, 4  ;;  %s300_s28 = int_to_ptr.vmem [resolvable:$true] %s299_s28 }
  0x42   :  { %309 = vmatmul.mubr.msk.f32.vlgmr.msra.gmra.mrb[0].mxu0 %vm67_vm0, %v57_v13  ;;  %376 = vmatprep.subr.bf16.mxu1 %v511_v17  ;;  %s475_s29 = scalar_lea.vmem %s300_s28, 128  ;;  %p480_p11 = scmp.lt.s32.totalorder %s300_s28, %s300_s28 }
  0x43   :  { %p476_p10 = scmp.ne.s32.totalorder %s300_s28, %s475_s29  ;;  %p481_p12 = scmp.lt.s32.totalorder %s475_s29, %s475_s29 }
  0x45   :  { %378 = vmatpush3.bf16.msra.mxu1 %v377_v23  ;;  %p482_p13 = por %p481_p12, %p480_p11 }
  0x46   :  { %379 = vmatprep.subr.bf16.mxu1 %v511_v17 }
  0x47   :  { %p483_p0 = pnand %p482_p13, %p476_p10 }
  0x49   :  { %381 = vmatpush3.bf16.msra.mxu1 %v380_v26  ;;  %v286_v26 = vsub.s32 3, %v163_v59 }
  0x4a   :  { %382 = vmatprep.subr.bf16.mxu1 %v511_v17 }
  0x4d   :  { %384 = vmatpush3.bf16.msra.mxu1 %v383_v29  ;;  %v287_v29 = vrot.slane %v58_v63, %v286_v26 }
  0x4e   :  { %385 = vmatprep.subr.bf16.mxu1 %v511_v17 }
  0x51   :  { %387 = vmatpush3.bf16.msra.mxu1 %v386_v32 }
  0x52   :  { %388 = vmatprep.subr.bf16.mxu1 %v511_v17 }
  0x55   :  { %390 = vmatpush3.bf16.msra.mxu1 %v389_v35 }
  0x56   :  { %391 = vmatprep.subr.bf16.mxu1 %v511_v17 }
  0x59   :  { %393 = vmatpush3.bf16.msra.mxu1 %v392_v38 }
 0x115   :  { %v137_v39 = vpop.f32.mrb[0].mxu0 }
 0x116   :  { %v142_v40 = vrot.slane %v137_v39, 4  ;;  %v139_v41 = vpop.f32.mrb[1].mxu0 }
 0x117   :  { %v288_v32 = vadd.f32 %v287_v29, %v139_v41 }
 0x118   :  { %v143_v42 = vadd.f32 %v142_v40, %v137_v39 }
 0x11a   :  { %v144_v43 = vrot.slane %v143_v42, 2 }
 0x11c   :  { %v145_v44 = vadd.f32 %v144_v43, %v143_v42 }
 0x11e   :  { %v146_v45 = vrot.slane %v145_v44, 1 }
 0x120   :  { %v147_v46 = vadd.f32 %v146_v45, %v145_v44 }
 0x122   :  { %v149_v47 = vmul.f32 0.125, %v147_v46 }
 0x124   :  { %v150_v48 = vsub.f32 %v137_v39, %v149_v47 }
 0x126   :  { %v151_v49 = vmul.f32 %v150_v48, %v150_v48 }
 0x128   :  { %v152_v50 = vrot.slane %v151_v49, 4 }
 0x12a   :  { %v153_v51 = vadd.f32 %v152_v50, %v151_v49 }
 0x12c   :  { %v154_v52 = vrot.slane %v153_v51, 2 }
 0x12e   :  { %v155_v53 = vadd.f32 %v154_v52, %v153_v51 }
 0x130   :  { %v156_v54 = vrot.slane %v155_v53, 1 }
 0x132   :  { %v157_v55 = vadd.f32 %v156_v54, %v155_v53 }
 0x134   :  { %v158_v56 = vmul.f32 0.125, %v157_v55 }
 0x136   :  { %v159_v57 = vadd.f32 1e-05, %v158_v56 }
 0x138   :  { %405 = vrsqrt.f32 %v159_v57 }
 0x142   :  { %v406_v62 = vpop.eup %405 }
 0x143   :  { %v161_v0 = vmul.f32 %v406_v62, %v58_v63 }
 0x145   :  { %v165_v1 = vrot.slane %v161_v0, %v164_v60 }
 0x147   :  { %v166_v3 = vmul.f32 %v165_v1, %v150_v48 }
 0x149   :  { %v171_v4 = vadd.f32 %v170_v2, %v166_v3 }
 0x14b   :  { %v172_v5 = vmul.f32 0.2, %v171_v4 }
 0x14d   :  { %v173_v6 = vmax.f32 %v171_v4, %v172_v5 }
 0x14f   :  { %360 = vmatmul.mubr.f32.vlgmr.msra.gmra.mrb[0].mxu1 %v173_v6 }
 0x222   :  { %v256_v7 = vpop.f32.mrb[0].mxu1 }
 0x223   :  { %v260_v8 = vrot.slane %v256_v7, 4  ;;  %v361_v9 = vpop.f32.mrb[1].mxu1 }
 0x225   :  { %v261_v10 = vadd.f32 %v260_v8, %v256_v7 }
 0x227   :  { %v262_v11 = vrot.slane %v261_v10, 2 }
 0x229   :  { %v263_v12 = vadd.f32 %v262_v11, %v261_v10 }
 0x22b   :  { %v264_v13 = vrot.slane %v263_v12, 1 }
 0x22d   :  { %v265_v14 = vadd.f32 %v264_v13, %v263_v12 }
 0x22f   :  { %v266_v15 = vmul.f32 0.125, %v265_v14 }
 0x231   :  { %v267_v16 = vsub.f32 %v256_v7, %v266_v15 }
 0x233   :  { %v268_v17 = vmul.f32 %v267_v16, %v267_v16 }
 0x235   :  { %v269_v18 = vrot.slane %v268_v17, 4 }
 0x237   :  { %v270_v19 = vadd.f32 %v269_v18, %v268_v17 }
 0x239   :  { %v271_v20 = vrot.slane %v270_v19, 2 }
 0x23b   :  { %v272_v21 = vadd.f32 %v271_v20, %v270_v19 }
 0x23d   :  { %v273_v22 = vrot.slane %v272_v21, 1 }
 0x23f   :  { %v274_v23 = vadd.f32 %v273_v22, %v272_v21 }
 0x241   :  { %v275_v24 = vmul.f32 0.125, %v274_v23 }
 0x243   :  { %v276_v25 = vadd.f32 1e-05, %v275_v24 }
 0x245   :  { %407 = vrsqrt.f32 %v276_v25 }
 0x24f   :  { %v408_v28 = vpop.eup %407 }
 0x250   :  { %v278_v30 = vmul.f32 %v408_v28, %v58_v63 }
 0x252   :  { %v282_v31 = vrot.slane %v278_v30, %v281_v27 }
 0x254   :  { %v283_v33 = vmul.f32 %v282_v31, %v267_v16 }
 0x256   :  { %v289_v34 = vadd.f32 %v288_v32, %v283_v33 }
 0x258   :  { %v290_v35 = vmul.f32 0.2, %v289_v34 }
 0x25a   :  { %v291_v36 = vmax.f32 %v289_v34, %v290_v35 }
 0x25c   :  { %292 = vst [vmem:[#allocation8] sm:$0xff] %v291_v36 }
 0x25d   :  { %486 = shalt.err (!%p483_p0)
}
 0x25e   :  { %s487_s6 = scalar_lea.hbm %s594_s4, 128 }
 0x25f   :  { %p488_p1 = scmp.ne.s32.totalorder %s594_s4, %s487_s6  ;;  %p491_p2 = scmp.lt.u32.totalorder %s487_s6, %s594_s4 }
 0x261   :  { %p493_p3 = pnand %p491_p2, %p488_p1 }
 0x263   :  { %496 = shalt.err (!%p493_p3)
}
 0x264   :  { %302 = dma.vmem_to_hbm [thread:$0]  %s300_s28, 128, %s594_s4, [#allocation4]  }
 0x265   :  { %501 = dma.done.wait [#allocation4], 128  }
 0x266   :  { %502 = vsyncadd [#allocation4], 4294967168 }
 0x267   :  { %306 = vsyncpa [#allocation3], 1 }
 0x268   :  { %307 = vsyncpa [#allocation6], 1 }
 0x269   :  { %308 = vsyncpa [#allocation4], 1 }

</bundles_post_ra>
